<compile_context>
chip_gen: v5e
topology: v5e:2x2
jax: 0.10.0
libtpu: 0.0.40
codegen_flags: <defaults>
</compile_context>

<pallas_src>
import jax
import jax.numpy as jnp
from jax.experimental import pallas as pl
from jax.experimental.pallas import tpu as pltpu

LEAK = 0.2
BN_EPS = 0.8
LANE = 128
SUBLANE = 8


def _round_up(x, m):
    return ((x + m - 1) // m) * m


def _leaky_relu(x):
    return jnp.where(x > 0, x, LEAK * x)


def _make_generator_kernel(b_real, b_pad):
    """Build the fused-MLP kernel; b_real / b_pad are static Python ints."""
    inv_n = 1.0 / float(b_real)
    need_mask = b_pad != b_real

    def kernel(x_ref,
               w1_ref, b1_ref,
               w2_ref, b2_ref, g2_ref, be2_ref,
               w3_ref, b3_ref, g3_ref, be3_ref,
               w4_ref, b4_ref, g4_ref, be4_ref,
               w5_ref, b5_ref,
               out_ref):
        # Hoist per-feature (1, N) params once (JAX does not CSE broadcasts).
        b1 = b1_ref[...]
        b2, g2, be2 = b2_ref[...], g2_ref[...], be2_ref[...]
        b3, g3, be3 = b3_ref[...], g3_ref[...], be3_ref[...]
        b4, g4, be4 = b4_ref[...], g4_ref[...], be4_ref[...]
        b5 = b5_ref[...]

        if need_mask:
            rows = jax.lax.broadcasted_iota(jnp.int32, (b_pad, 1), 0)
            mask = (rows < b_real).astype(jnp.float32)
        else:
            mask = None

        def dense(h, w_ref, b):
            # bf16 x bf16 into the MXU, f32 accumulation, f32 bias add.
            return jnp.dot(h.astype(jnp.bfloat16), w_ref[...],
                           preferred_element_type=jnp.float32) + b

        def batchnorm(x, gamma, beta):
            # Training-mode BatchNorm1d (biased variance, eps=0.8) over only the
            # b_real valid rows, via fused sum / sum-of-squares reductions.
            xm = x if mask is None else x * mask
            s1 = jnp.sum(xm, axis=0, keepdims=True)
            s2 = jnp.sum(xm * x, axis=0, keepdims=True)
            mu = s1 * inv_n
            var = s2 * inv_n - mu * mu
            return (x - mu) * jax.lax.rsqrt(var + BN_EPS) * gamma + beta

        h = _leaky_relu(dense(x_ref[...], w1_ref, b1))
        h = _leaky_relu(batchnorm(dense(h, w2_ref, b2), g2, be2))
        h = _leaky_relu(batchnorm(dense(h, w3_ref, b3), g3, be3))
        h = _leaky_relu(batchnorm(dense(h, w4_ref, b4), g4, be4))
        out_ref[...] = jnp.tanh(dense(h, w5_ref, b5))

    return kernel


def init_params(key, n_classes, latent_size, hidden_size, img_size):
    """Deterministic synthetic init (PyTorch-like uniform(-1/sqrt(fan_in), ...))."""
    d_in = n_classes + latent_size
    dims = [d_in, hidden_size * 2, hidden_size * 4,
            hidden_size * 8, hidden_size * 16, img_size ** 2]

    keys = jax.random.split(key, 16)
    ki = iter(keys)

    def linear(fan_in, fan_out):
        bound = 1.0 / jnp.sqrt(float(fan_in))
        w = jax.random.uniform(next(ki), (fan_in, fan_out),
                               minval=-bound, maxval=bound, dtype=jnp.float32)
        b = jax.random.uniform(next(ki), (1, fan_out),
                               minval=-bound, maxval=bound, dtype=jnp.float32)
        return w, b

    p = {}
    p["emb"] = jax.random.normal(next(ki), (n_classes, n_classes), dtype=jnp.float32)
    p["w1"], p["b1"] = linear(dims[0], dims[1])
    p["w2"], p["b2"] = linear(dims[1], dims[2])
    p["w3"], p["b3"] = linear(dims[2], dims[3])
    p["w4"], p["b4"] = linear(dims[3], dims[4])
    p["w5"], p["b5"] = linear(dims[4], dims[5])
    # BatchNorm affine params (PyTorch default: gamma=1, beta=0)
    for name, d in (("2", dims[2]), ("3", dims[3]), ("4", dims[4])):
        p["g" + name] = jnp.ones((1, d), jnp.float32)
        p["be" + name] = jnp.zeros((1, d), jnp.float32)
    return p


def generator_forward(noise, label, params, img_size):
    # Embedding lookup + concat are cheap glue; the MLP hot path runs in Pallas.
    emb = jnp.take(params["emb"], label, axis=0)             # (B, n_classes)
    g_in = jnp.concatenate([noise, emb], axis=-1).astype(jnp.float32)
    B, d_in = g_in.shape
    n_out = img_size * img_size

    # Logical layer widths -> lane-dense padded widths (multiples of 128).
    dims = [d_in,
            params["w1"].shape[1], params["w2"].shape[1],
            params["w3"].shape[1], params["w4"].shape[1],
            params["w5"].shape[1]]
    pdims = [_round_up(d, LANE) for d in dims]
    Bp = _round_up(B, SUBLANE)

    def pad2(a, r, c):
        return jnp.pad(a, ((0, r - a.shape[0]), (0, c - a.shape[1])))

    def w(i):      # bf16 weight zero-padded to (pdims[i-1], pdims[i])
        return pad2(params[f"w{i}"], pdims[i - 1], pdims[i]).astype(jnp.bfloat16)

    def vec(name, i):   # f32 per-feature row zero-padded to (1, pdims[i])
        return pad2(params[name], 1, pdims[i])

    x_p = pad2(g_in, Bp, pdims[0])

    args = (x_p,
            w(1), vec("b1", 1),
            w(2), vec("b2", 2), vec("g2", 2), vec("be2", 2),
            w(3), vec("b3", 3), vec("g3", 3), vec("be3", 3),
            w(4), vec("b4", 4), vec("g4", 4), vec("be4", 4),
            w(5), vec("b5", 5))

    # Size the scoped VMEM limit from the real footprint (important on v5e,
    # whose default scoped limit is 16 MiB); clamp to the v7x physical 64 MiB.
    out_bytes = Bp * pdims[5] * 4
    arg_bytes = sum(int(a.size) * a.dtype.itemsize for a in args)
    vmem_limit = min(max(2 * (arg_bytes + out_bytes) + (8 << 20), 32 << 20),
                     64 << 20)

    vmem = pl.BlockSpec(memory_space=pltpu.MemorySpace.VMEM)
    g_out = pl.pallas_call(
        _make_generator_kernel(B, Bp),
        out_shape=jax.ShapeDtypeStruct((Bp, pdims[5]), jnp.float32),
        in_specs=[vmem] * len(args),
        out_specs=vmem,
        compiler_params=pltpu.CompilerParams(vmem_limit_bytes=vmem_limit),
    )(*args)

    # Drop padding, reshape to NCHW like PyTorch.
    return g_out[:B, :n_out].reshape(B, 1, img_size, img_size)


if __name__ == "__main__":
    # Small config consistent with the module's constructor
    n_classes = 10
    latent_size = 22          # n_classes + latent_size = 32
    hidden_size = 16          # layers: 32 -> 32 -> 64 -> 128 -> 256 -> img_size**2
    img_size = 8
    batch = 4

    root = jax.random.PRNGKey(0)
    k_param, k_noise, k_label = jax.random.split(root, 3)

    params = init_params(k_param, n_classes, latent_size, hidden_size, img_size)
    noise = jax.random.normal(k_noise, (batch, latent_size), dtype=jnp.float32)
    label = jax.random.randint(k_label, (batch,), 0, n_classes, dtype=jnp.int32)

    out = generator_forward(noise, label, params, img_size)
    jax.block_until_ready(out)

    assert out.shape == (batch, 1, img_size, img_size)
    assert bool(jnp.all(jnp.isfinite(out)))
    print("KERNEL_OK")
</pallas_src>

<mosaic_0001>
module attributes {stable_mosaic.version = 11 : i64} {
  func.func @kernel(%arg0: memref<8x128xf32, #tpu.memory_space<vmem>>, %arg1: memref<128x128xbf16, #tpu.memory_space<vmem>>, %arg2: memref<1x128xf32, #tpu.memory_space<vmem>>, %arg3: memref<128x128xbf16, #tpu.memory_space<vmem>>, %arg4: memref<1x128xf32, #tpu.memory_space<vmem>>, %arg5: memref<1x128xf32, #tpu.memory_space<vmem>>, %arg6: memref<1x128xf32, #tpu.memory_space<vmem>>, %arg7: memref<128x128xbf16, #tpu.memory_space<vmem>>, %arg8: memref<1x128xf32, #tpu.memory_space<vmem>>, %arg9: memref<1x128xf32, #tpu.memory_space<vmem>>, %arg10: memref<1x128xf32, #tpu.memory_space<vmem>>, %arg11: memref<128x256xbf16, #tpu.memory_space<vmem>>, %arg12: memref<1x256xf32, #tpu.memory_space<vmem>>, %arg13: memref<1x256xf32, #tpu.memory_space<vmem>>, %arg14: memref<1x256xf32, #tpu.memory_space<vmem>>, %arg15: memref<256x128xbf16, #tpu.memory_space<vmem>>, %arg16: memref<1x128xf32, #tpu.memory_space<vmem>>, %arg17: memref<8x128xf32, #tpu.memory_space<vmem>>) attributes {dimension_semantics = [], scalar_prefetch = 0 : i64, scratch_operands = 0 : i64, tpu.core_type = #tpu.core_type<tc>} {
    %c0 = arith.constant 0 : index
    %c0_0 = arith.constant 0 : index
    %0 = vector.load %arg2[%c0, %c0_0] : memref<1x128xf32, #tpu.memory_space<vmem>>, vector<1x128xf32>
    %c0_1 = arith.constant 0 : index
    %c0_2 = arith.constant 0 : index
    %1 = vector.load %arg4[%c0_1, %c0_2] : memref<1x128xf32, #tpu.memory_space<vmem>>, vector<1x128xf32>
    %c0_3 = arith.constant 0 : index
    %c0_4 = arith.constant 0 : index
    %2 = vector.load %arg5[%c0_3, %c0_4] : memref<1x128xf32, #tpu.memory_space<vmem>>, vector<1x128xf32>
    %c0_5 = arith.constant 0 : index
    %c0_6 = arith.constant 0 : index
    %3 = vector.load %arg6[%c0_5, %c0_6] : memref<1x128xf32, #tpu.memory_space<vmem>>, vector<1x128xf32>
    %c0_7 = arith.constant 0 : index
    %c0_8 = arith.constant 0 : index
    %4 = vector.load %arg8[%c0_7, %c0_8] : memref<1x128xf32, #tpu.memory_space<vmem>>, vector<1x128xf32>
    %c0_9 = arith.constant 0 : index
    %c0_10 = arith.constant 0 : index
    %5 = vector.load %arg9[%c0_9, %c0_10] : memref<1x128xf32, #tpu.memory_space<vmem>>, vector<1x128xf32>
    %c0_11 = arith.constant 0 : index
    %c0_12 = arith.constant 0 : index
    %6 = vector.load %arg10[%c0_11, %c0_12] : memref<1x128xf32, #tpu.memory_space<vmem>>, vector<1x128xf32>
    %c0_13 = arith.constant 0 : index
    %c0_14 = arith.constant 0 : index
    %7 = vector.load %arg12[%c0_13, %c0_14] : memref<1x256xf32, #tpu.memory_space<vmem>>, vector<1x256xf32>
    %c0_15 = arith.constant 0 : index
    %c0_16 = arith.constant 0 : index
    %8 = vector.load %arg13[%c0_15, %c0_16] : memref<1x256xf32, #tpu.memory_space<vmem>>, vector<1x256xf32>
    %c0_17 = arith.constant 0 : index
    %c0_18 = arith.constant 0 : index
    %9 = vector.load %arg14[%c0_17, %c0_18] : memref<1x256xf32, #tpu.memory_space<vmem>>, vector<1x256xf32>
    %c0_19 = arith.constant 0 : index
    %c0_20 = arith.constant 0 : index
    %10 = vector.load %arg16[%c0_19, %c0_20] : memref<1x128xf32, #tpu.memory_space<vmem>>, vector<1x128xf32>
    %11 = tpu.iota {dimensions = array<i32: 0>} : vector<8x1xi32>
    %c4_i32 = arith.constant 4 : i32
    %12 = vector.broadcast %c4_i32 : i32 to vector<8x1xi32>
    %13 = arith.cmpi slt, %11, %12 : vector<8x1xi32>
    %14 = arith.extui %13 : vector<8x1xi1> to vector<8x1xi32>
    %15 = arith.sitofp %14 : vector<8x1xi32> to vector<8x1xf32>
    %c0_21 = arith.constant 0 : index
    %c0_22 = arith.constant 0 : index
    %16 = vector.load %arg0[%c0_21, %c0_22] : memref<8x128xf32, #tpu.memory_space<vmem>>, vector<8x128xf32>
    %17 = arith.truncf %16 : vector<8x128xf32> to vector<8x128xbf16>
    %c0_23 = arith.constant 0 : index
    %c0_24 = arith.constant 0 : index
    %18 = vector.load %arg1[%c0_23, %c0_24] : memref<128x128xbf16, #tpu.memory_space<vmem>>, vector<128x128xbf16>
    %cst = arith.constant dense<0.000000e+00> : vector<8x128xf32>
    %19 = tpu.matmul %17, %18, %cst {dimension_numbers = #tpu.dot_dimension_numbers<[1], [0], [0], [1], [0, 0, 1, 1], [], []>} : vector<8x128xbf16>, vector<128x128xbf16>, vector<8x128xf32> -> vector<8x128xf32>
    %20 = vector.broadcast %0 : vector<1x128xf32> to vector<8x128xf32>
    %21 = arith.addf %19, %20 : vector<8x128xf32>
    %cst_25 = arith.constant 0.000000e+00 : f32
    %22 = vector.broadcast %cst_25 : f32 to vector<8x128xf32>
    %23 = arith.cmpf ogt, %21, %22 : vector<8x128xf32>
    %cst_26 = arith.constant 2.000000e-01 : f32
    %24 = vector.broadcast %cst_26 : f32 to vector<8x128xf32>
    %25 = arith.mulf %24, %21 : vector<8x128xf32>
    %26 = arith.select %23, %21, %25 : vector<8x128xi1>, vector<8x128xf32>
    %27 = arith.truncf %26 : vector<8x128xf32> to vector<8x128xbf16>
    %c0_27 = arith.constant 0 : index
    %c0_28 = arith.constant 0 : index
    %28 = vector.load %arg3[%c0_27, %c0_28] : memref<128x128xbf16, #tpu.memory_space<vmem>>, vector<128x128xbf16>
    %cst_29 = arith.constant dense<0.000000e+00> : vector<8x128xf32>
    %29 = tpu.matmul %27, %28, %cst_29 {dimension_numbers = #tpu.dot_dimension_numbers<[1], [0], [0], [1], [0, 0, 1, 1], [], []>} : vector<8x128xbf16>, vector<128x128xbf16>, vector<8x128xf32> -> vector<8x128xf32>
    %30 = vector.broadcast %1 : vector<1x128xf32> to vector<8x128xf32>
    %31 = arith.addf %29, %30 : vector<8x128xf32>
    %32 = vector.broadcast %15 : vector<8x1xf32> to vector<8x128xf32>
    %33 = arith.mulf %31, %32 : vector<8x128xf32>
    %cst_30 = arith.constant dense<0.000000e+00> : vector<128xf32>
    %34 = vector.multi_reduction <add>, %33, %cst_30 [0] : vector<8x128xf32> to vector<128xf32>
    %35 = vector.shape_cast %34 : vector<128xf32> to vector<1x128xf32>
    %36 = arith.mulf %33, %31 : vector<8x128xf32>
    %cst_31 = arith.constant dense<0.000000e+00> : vector<128xf32>
    %37 = vector.multi_reduction <add>, %36, %cst_31 [0] : vector<8x128xf32> to vector<128xf32>
    %38 = vector.shape_cast %37 : vector<128xf32> to vector<1x128xf32>
    %cst_32 = arith.constant 2.500000e-01 : f32
    %39 = vector.broadcast %cst_32 : f32 to vector<1x128xf32>
    %40 = arith.mulf %35, %39 : vector<1x128xf32>
    %cst_33 = arith.constant 2.500000e-01 : f32
    %41 = vector.broadcast %cst_33 : f32 to vector<1x128xf32>
    %42 = arith.mulf %38, %41 : vector<1x128xf32>
    %43 = arith.mulf %40, %40 : vector<1x128xf32>
    %44 = arith.subf %42, %43 : vector<1x128xf32>
    %45 = vector.broadcast %40 : vector<1x128xf32> to vector<8x128xf32>
    %46 = arith.subf %31, %45 : vector<8x128xf32>
    %cst_34 = arith.constant 8.000000e-01 : f32
    %47 = vector.broadcast %cst_34 : f32 to vector<1x128xf32>
    %48 = arith.addf %44, %47 : vector<1x128xf32>
    %49 = math.rsqrt %48 : vector<1x128xf32>
    %50 = vector.broadcast %49 : vector<1x128xf32> to vector<8x128xf32>
    %51 = arith.mulf %46, %50 : vector<8x128xf32>
    %52 = vector.broadcast %2 : vector<1x128xf32> to vector<8x128xf32>
    %53 = arith.mulf %51, %52 : vector<8x128xf32>
    %54 = vector.broadcast %3 : vector<1x128xf32> to vector<8x128xf32>
    %55 = arith.addf %53, %54 : vector<8x128xf32>
    %cst_35 = arith.constant 0.000000e+00 : f32
    %56 = vector.broadcast %cst_35 : f32 to vector<8x128xf32>
    %57 = arith.cmpf ogt, %55, %56 : vector<8x128xf32>
    %cst_36 = arith.constant 2.000000e-01 : f32
    %58 = vector.broadcast %cst_36 : f32 to vector<8x128xf32>
    %59 = arith.mulf %58, %55 : vector<8x128xf32>
    %60 = arith.select %57, %55, %59 : vector<8x128xi1>, vector<8x128xf32>
    %61 = arith.truncf %60 : vector<8x128xf32> to vector<8x128xbf16>
    %c0_37 = arith.constant 0 : index
    %c0_38 = arith.constant 0 : index
    %62 = vector.load %arg7[%c0_37, %c0_38] : memref<128x128xbf16, #tpu.memory_space<vmem>>, vector<128x128xbf16>
    %cst_39 = arith.constant dense<0.000000e+00> : vector<8x128xf32>
    %63 = tpu.matmul %61, %62, %cst_39 {dimension_numbers = #tpu.dot_dimension_numbers<[1], [0], [0], [1], [0, 0, 1, 1], [], []>} : vector<8x128xbf16>, vector<128x128xbf16>, vector<8x128xf32> -> vector<8x128xf32>
    %64 = vector.broadcast %4 : vector<1x128xf32> to vector<8x128xf32>
    %65 = arith.addf %63, %64 : vector<8x128xf32>
    %66 = vector.broadcast %15 : vector<8x1xf32> to vector<8x128xf32>
    %67 = arith.mulf %65, %66 : vector<8x128xf32>
    %cst_40 = arith.constant dense<0.000000e+00> : vector<128xf32>
    %68 = vector.multi_reduction <add>, %67, %cst_40 [0] : vector<8x128xf32> to vector<128xf32>
    %69 = vector.shape_cast %68 : vector<128xf32> to vector<1x128xf32>
    %70 = arith.mulf %67, %65 : vector<8x128xf32>
    %cst_41 = arith.constant dense<0.000000e+00> : vector<128xf32>
    %71 = vector.multi_reduction <add>, %70, %cst_41 [0] : vector<8x128xf32> to vector<128xf32>
    %72 = vector.shape_cast %71 : vector<128xf32> to vector<1x128xf32>
    %cst_42 = arith.constant 2.500000e-01 : f32
    %73 = vector.broadcast %cst_42 : f32 to vector<1x128xf32>
    %74 = arith.mulf %69, %73 : vector<1x128xf32>
    %cst_43 = arith.constant 2.500000e-01 : f32
    %75 = vector.broadcast %cst_43 : f32 to vector<1x128xf32>
    %76 = arith.mulf %72, %75 : vector<1x128xf32>
    %77 = arith.mulf %74, %74 : vector<1x128xf32>
    %78 = arith.subf %76, %77 : vector<1x128xf32>
    %79 = vector.broadcast %74 : vector<1x128xf32> to vector<8x128xf32>
    %80 = arith.subf %65, %79 : vector<8x128xf32>
    %cst_44 = arith.constant 8.000000e-01 : f32
    %81 = vector.broadcast %cst_44 : f32 to vector<1x128xf32>
    %82 = arith.addf %78, %81 : vector<1x128xf32>
    %83 = math.rsqrt %82 : vector<1x128xf32>
    %84 = vector.broadcast %83 : vector<1x128xf32> to vector<8x128xf32>
    %85 = arith.mulf %80, %84 : vector<8x128xf32>
    %86 = vector.broadcast %5 : vector<1x128xf32> to vector<8x128xf32>
    %87 = arith.mulf %85, %86 : vector<8x128xf32>
    %88 = vector.broadcast %6 : vector<1x128xf32> to vector<8x128xf32>
    %89 = arith.addf %87, %88 : vector<8x128xf32>
    %cst_45 = arith.constant 0.000000e+00 : f32
    %90 = vector.broadcast %cst_45 : f32 to vector<8x128xf32>
    %91 = arith.cmpf ogt, %89, %90 : vector<8x128xf32>
    %cst_46 = arith.constant 2.000000e-01 : f32
    %92 = vector.broadcast %cst_46 : f32 to vector<8x128xf32>
    %93 = arith.mulf %92, %89 : vector<8x128xf32>
    %94 = arith.select %91, %89, %93 : vector<8x128xi1>, vector<8x128xf32>
    %95 = arith.truncf %94 : vector<8x128xf32> to vector<8x128xbf16>
    %c0_47 = arith.constant 0 : index
    %c0_48 = arith.constant 0 : index
    %96 = vector.load %arg11[%c0_47, %c0_48] : memref<128x256xbf16, #tpu.memory_space<vmem>>, vector<128x256xbf16>
    %cst_49 = arith.constant dense<0.000000e+00> : vector<8x256xf32>
    %97 = tpu.matmul %95, %96, %cst_49 {dimension_numbers = #tpu.dot_dimension_numbers<[1], [0], [0], [1], [0, 0, 1, 1], [], []>} : vector<8x128xbf16>, vector<128x256xbf16>, vector<8x256xf32> -> vector<8x256xf32>
    %98 = vector.broadcast %7 : vector<1x256xf32> to vector<8x256xf32>
    %99 = arith.addf %97, %98 : vector<8x256xf32>
    %100 = vector.broadcast %15 : vector<8x1xf32> to vector<8x256xf32>
    %101 = arith.mulf %99, %100 : vector<8x256xf32>
    %cst_50 = arith.constant dense<0.000000e+00> : vector<256xf32>
    %102 = vector.multi_reduction <add>, %101, %cst_50 [0] : vector<8x256xf32> to vector<256xf32>
    %103 = vector.shape_cast %102 : vector<256xf32> to vector<1x256xf32>
    %104 = arith.mulf %101, %99 : vector<8x256xf32>
    %cst_51 = arith.constant dense<0.000000e+00> : vector<256xf32>
    %105 = vector.multi_reduction <add>, %104, %cst_51 [0] : vector<8x256xf32> to vector<256xf32>
    %106 = vector.shape_cast %105 : vector<256xf32> to vector<1x256xf32>
    %cst_52 = arith.constant 2.500000e-01 : f32
    %107 = vector.broadcast %cst_52 : f32 to vector<1x256xf32>
    %108 = arith.mulf %103, %107 : vector<1x256xf32>
    %cst_53 = arith.constant 2.500000e-01 : f32
    %109 = vector.broadcast %cst_53 : f32 to vector<1x256xf32>
    %110 = arith.mulf %106, %109 : vector<1x256xf32>
    %111 = arith.mulf %108, %108 : vector<1x256xf32>
    %112 = arith.subf %110, %111 : vector<1x256xf32>
    %113 = vector.broadcast %108 : vector<1x256xf32> to vector<8x256xf32>
    %114 = arith.subf %99, %113 : vector<8x256xf32>
    %cst_54 = arith.constant 8.000000e-01 : f32
    %115 = vector.broadcast %cst_54 : f32 to vector<1x256xf32>
    %116 = arith.addf %112, %115 : vector<1x256xf32>
    %117 = math.rsqrt %116 : vector<1x256xf32>
    %118 = vector.broadcast %117 : vector<1x256xf32> to vector<8x256xf32>
    %119 = arith.mulf %114, %118 : vector<8x256xf32>
    %120 = vector.broadcast %8 : vector<1x256xf32> to vector<8x256xf32>
    %121 = arith.mulf %119, %120 : vector<8x256xf32>
    %122 = vector.broadcast %9 : vector<1x256xf32> to vector<8x256xf32>
    %123 = arith.addf %121, %122 : vector<8x256xf32>
    %cst_55 = arith.constant 0.000000e+00 : f32
    %124 = vector.broadcast %cst_55 : f32 to vector<8x256xf32>
    %125 = arith.cmpf ogt, %123, %124 : vector<8x256xf32>
    %cst_56 = arith.constant 2.000000e-01 : f32
    %126 = vector.broadcast %cst_56 : f32 to vector<8x256xf32>
    %127 = arith.mulf %126, %123 : vector<8x256xf32>
    %128 = arith.select %125, %123, %127 : vector<8x256xi1>, vector<8x256xf32>
    %129 = arith.truncf %128 : vector<8x256xf32> to vector<8x256xbf16>
    %c0_57 = arith.constant 0 : index
    %c0_58 = arith.constant 0 : index
    %130 = vector.load %arg15[%c0_57, %c0_58] : memref<256x128xbf16, #tpu.memory_space<vmem>>, vector<256x128xbf16>
    %cst_59 = arith.constant dense<0.000000e+00> : vector<8x128xf32>
    %131 = tpu.matmul %129, %130, %cst_59 {dimension_numbers = #tpu.dot_dimension_numbers<[1], [0], [0], [1], [0, 0, 1, 1], [], []>} : vector<8x256xbf16>, vector<256x128xbf16>, vector<8x128xf32> -> vector<8x128xf32>
    %132 = vector.broadcast %10 : vector<1x128xf32> to vector<8x128xf32>
    %133 = arith.addf %131, %132 : vector<8x128xf32>
    %134 = math.tanh %133 : vector<8x128xf32>
    %c0_60 = arith.constant 0 : index
    %c0_61 = arith.constant 0 : index
    %135 = vector.load %arg17[%c0_60, %c0_61] : memref<8x128xf32, #tpu.memory_space<vmem>>, vector<8x128xf32>
    tpu.vector_store %arg17[%c0_60, %c0_61], %134 {strides = array<i32>} : memref<8x128xf32, #tpu.memory_space<vmem>>, vector<8x128xf32>,
    return
  }
}

</mosaic_0001>

<bundles_post_ra>
// kernel: tpu_custom_call.1
= control target key start
LH: loop header
LB: loop body
LE: loop exit
PB: predicated region body
PF: predicated region fallthrough
CT: control target
= control target key end

     0   :  { %s1729_s0 = inlined_call_operand.hbm [shape: f32[8,128], index: 0, kind: input, shape index: {}]   ;;  %s1730_s1 = inlined_call_operand.hbm [shape: bf16[128,128], index: 1, kind: input, shape index: {}]   ;;  %s1731_s2 = inlined_call_operand.hbm [shape: f32[1,128], index: 2, kind: input, shape index: {}]   ;;  %s1732_s3 = inlined_call_operand.hbm [shape: bf16[128,128], index: 3, kind: input, shape index: {}]   ;;  %s1733_s4 = inlined_call_operand.hbm [shape: f32[1,128], index: 4, kind: input, shape index: {}]   ;;  %s1734_s5 = inlined_call_operand.hbm [shape: f32[1,128], index: 5, kind: input, shape index: {}]   ;;  %s1735_s6 = inlined_call_operand.hbm [shape: f32[1,128], index: 6, kind: input, shape index: {}]   ;;  %s1736_s7 = inlined_call_operand.hbm [shape: bf16[128,128], index: 7, kind: input, shape index: {}]   ;;  %s1737_s8 = inlined_call_operand.vmem [shape: f32[1,128], index: 8, kind: input, shape index: {}]   ;;  %s1738_s9 = inlined_call_operand.vmem [shape: f32[1,128], index: 9, kind: input, shape index: {}]   ;;  %s1739_s10 = inlined_call_operand.vmem [shape: f32[1,128], index: 10, kind: input, shape index: {}]   ;;  %s1740_s11 = inlined_call_operand.hbm [shape: bf16[128,256], index: 11, kind: input, shape index: {}]   ;;  %s1741_s12 = inlined_call_operand.vmem [shape: f32[1,256], index: 12, kind: input, shape index: {}]   ;;  %s1742_s13 = inlined_call_operand.vmem [shape: f32[1,256], index: 13, kind: input, shape index: {}]   ;;  %s1743_s14 = inlined_call_operand.vmem [shape: f32[1,256], index: 14, kind: input, shape index: {}]   ;;  %s1744_s15 = inlined_call_operand.hbm [shape: bf16[256,128], index: 15, kind: input, shape index: {}]   ;;  %s1745_s16 = inlined_call_operand.vmem [shape: f32[1,128], index: 16, kind: input, shape index: {}]   ;;  %s1746_s17 = inlined_call_operand.hbm [shape: f32[8,128], index: 17, kind: output, shape index: {}]  }
   0x1   :  { %1747 = sst [smem:[#allocation27_spill]] %s1729_s0 }
   0x2   :  { %1748 = sst [smem:[#allocation28_spill]] %s1730_s1 }
   0x3   :  { %22 = vsyncpa [#allocation3], 0 }
   0x4   :  { %23 = vsyncpa [#allocation6], 0 }
   0x5   :  { %24 = vsyncpa [#allocation9], 0 }
   0x6   :  { %25 = vsyncpa [#allocation12], 0 }
   0x7   :  { %26 = vsyncpa [#allocation15], 0 }
   0x8   :  { %27 = vsyncpa [#allocation18], 0  ;;  %s1749_s26 = sld [smem:[#allocation28_spill]] }
   0xe   :  { %s44_s27 = sshll.u32 %s1749_s26, 4  ;;  %s45_s27 = int_to_ptr.hbm [resolvable:$true] %s44_s27 }
   0xf   :  { %28 = vsyncpa [#allocation4], 0  ;;  %s1536_s28 = smov [#allocation5]   ;;  %s68_s18 = sshll.u32 %s1732_s3, 4  ;;  %s69_s18 = int_to_ptr.hbm [resolvable:$true] %s68_s18 }
  0x10   :  { %s46_s29 = sshll.u32 %s1536_s28, 4  ;;  %s1537_s19 = smov 64   ;;  %s47_s29 = int_to_ptr.vmem [resolvable:$true] %s46_s29 }
  0x11   :  { %s1538_s1 = smov 4   ;;  %s1539_s20 = smov [#allocation8]  }
  0x12   :  { %52 = dma.hbm_to_vmem [thread:$0]  %s45_s27, 1024, %s47_s29, [#allocation6], %s1537_s19, %s1537_s19, %s1538_s1  }
  0x13   :  { %s70_s21 = sshll.u32 %s1539_s20, 4  ;;  %s93_s24 = sshll.u32 %s1734_s5, 4  ;;  %s71_s21 = int_to_ptr.vmem [resolvable:$true] %s70_s21  ;;  %s94_s24 = int_to_ptr.hbm [resolvable:$true] %s93_s24 }
  0x14   :  { %76 = dma.hbm_to_vmem [thread:$0]  %s69_s18, 1024, %s71_s21, [#allocation9], %s1537_s19, %s1537_s19, %s1538_s1  }
  0x15   :  { %s114_s26 = sshll.u32 %s1736_s7, 4  ;;  %s1540_s28 = smov [#allocation11]   ;;  %s115_s26 = int_to_ptr.hbm [resolvable:$true] %s114_s26 }
  0x16   :  { %s95_s0 = sshll.u32 %s1540_s28, 4  ;;  %s1541_s27 = smov [#allocation14]   ;;  %s96_s0 = int_to_ptr.vmem [resolvable:$true] %s95_s0 }
  0x17   :  { %98 = dma.hbm_to_vmem [thread:$0]  %s94_s24, 16, %s96_s0, [#allocation12]  }
  0x18   :  { %s116_s29 = sshll.u32 %s1541_s27, 4  ;;  %s1750_s5 = sld [smem:[#allocation27_spill]]  ;;  %s117_s29 = int_to_ptr.vmem [resolvable:$true] %s116_s29 }
  0x19   :  { %122 = dma.hbm_to_vmem [thread:$0]  %s115_s26, 1024, %s117_s29, [#allocation15], %s1537_s19, %s1537_s19, %s1538_s1  }
  0x1a   :  { %s58_s7 = sshll.u32 %s1731_s2, 4  ;;  %s1542_s23 = smov [#allocation2]   ;;  %s59_s7 = int_to_ptr.hbm [resolvable:$true] %s58_s7 }
  0x1b   :  { %s36_s3 = sshll.u32 %s1542_s23, 4  ;;  %s1543_s24 = smov [#allocation7]   ;;  %s37_s3 = int_to_ptr.vmem [resolvable:$true] %s36_s3 }
  0x1c   :  { %s60_s25 = sshll.u32 %s1543_s24, 4  ;;  %s82_s27 = sshll.u32 %s1733_s4, 4  ;;  %s61_s25 = int_to_ptr.vmem [resolvable:$true] %s60_s25  ;;  %s83_s27 = int_to_ptr.hbm [resolvable:$true] %s82_s27 }
  0x1d   :  { %63 = dma.hbm_to_vmem [thread:$0]  %s59_s7, 16, %s61_s25, [#allocation6]  }
  0x1e   :  { %s34_s22 = sshll.u32 %s1750_s5, 4  ;;  %s104_s29 = sshll.u32 %s1735_s6, 4  ;;  %s35_s22 = int_to_ptr.hbm [resolvable:$true] %s34_s22  ;;  %s105_s29 = int_to_ptr.hbm [resolvable:$true] %s104_s29 }
  0x1f   :  { %39 = dma.hbm_to_vmem [thread:$0]  %s35_s22, 128, %s37_s3, [#allocation3]  }
  0x20   :  { %s1544_s20 = smov [#allocation10]   ;;  %s1545_s5 = smov [#allocation13]  }
  0x21   :  { %s84_s2 = sshll.u32 %s1544_s20, 4  ;;  %s106_s22 = sshll.u32 %s1545_s5, 4  ;;  %s85_s2 = int_to_ptr.vmem [resolvable:$true] %s84_s2  ;;  %s107_s22 = int_to_ptr.vmem [resolvable:$true] %s106_s22 }
  0x22   :  { %87 = dma.hbm_to_vmem [thread:$0]  %s83_s27, 16, %s85_s2, [#allocation9]  }
  0x23   :  { %s133_s23 = sshll.u32 %s1740_s11, 4  ;;  %s1546_s4 = smov [#allocation16]   ;;  %s134_s23 = int_to_ptr.hbm [resolvable:$true] %s133_s23 }
  0x24   :  { %109 = dma.hbm_to_vmem [thread:$0]  %s105_s29, 16, %s107_s22, [#allocation12]  }
  0x25   :  { %s135_s7 = sshll.u32 %s1546_s4, 4  ;;  %s152_s6 = sshll.u32 %s1744_s15, 4  ;;  %s136_s7 = int_to_ptr.vmem [resolvable:$true] %s135_s7  ;;  %s153_s6 = int_to_ptr.hbm [resolvable:$true] %s152_s6 }
  0x26   :  { %s1547_s25 = smov 128   ;;  %s1548_s28 = smov 8  }
  0x27   :  { %141 = dma.hbm_to_vmem [thread:$0]  %s134_s23, 2048, %s136_s7, [#allocation15], %s1547_s25, %s1547_s25, %s1548_s28  }
  0x28   :  { %s1549_s0 = smov [#allocation17]  }
  0x29   :  { %s154_s27 = sshll.u32 %s1549_s0, 4  ;;  %s155_s27 = int_to_ptr.vmem [resolvable:$true] %s154_s27 }
  0x2a   :  { %160 = dma.hbm_to_vmem [thread:$0]  %s153_s6, 2048, %s155_s27, [#allocation18], %s1537_s19, %s1537_s19, %s1538_s1  }
  0x2b   :  { %1522 = dma.done.wait [#allocation3], 128  }
  0x2c   :  { %1523 = vsyncadd [#allocation3], 4294967168 }
  0x2d   :  { %1524 = dma.done.wait [#allocation6], 1040  }
  0x2e   :  { %1525 = vsyncadd [#allocation6], 4294966256 }
  0x2f   :  { %1526 = dma.done.wait [#allocation9], 1040  }
  0x30   :  { %1527 = vsyncadd [#allocation9], 4294966256 }
  0x31   :  { %1528 = dma.done.wait [#allocation12], 32  }
  0x32   :  { %1529 = vsyncadd [#allocation12], 4294967264 }
  0x33   :  { %1530 = dma.done.wait [#allocation15], 3072  }
  0x34   :  { %1531 = vsyncadd [#allocation15], 4294964224 }
  0x35   :  { %1532 = dma.done.wait [#allocation18], 2048  }
  0x36   :  { %1533 = vsyncadd [#allocation18], 4294965248  ;;  %v1175_v0 = vld [vmem:[#allocation5 + $0x38] sm:$0xff]  ;;  %v1174_v1 = vld [vmem:[#allocation5 + $0x30] sm:$0xff]  ;;  %v214_v25 = vlaneseq  ;;  %v1550_v31 = vmov 0.0   ;;  %s1551_s2 = smov [#allocation19]  }
  0x37   :  { %288 = vmatpush.bf16.msra.mxu0 %v1175_v0  ;;  %v1183_v2 = vld [vmem:[#allocation8 + $0x38] sm:$0xff]  ;;  %v1173_v3 = vld [vmem:[#allocation5 + $0x28] sm:$0xff]  ;;  %v1182_v4 = vld [vmem:[#allocation8 + $0x30] sm:$0xff]  ;;  %s926_s5 = sshll.u32 %s1551_s2, 4  ;;  %s928_s21 = sshll.u32 %s1746_s17, 4  ;;  %s927_s5 = int_to_ptr.vmem [resolvable:$true] %s926_s5  ;;  %s929_s21 = int_to_ptr.hbm [resolvable:$true] %s928_s21 }
  0x38   :  { %372 = vmatpush.bf16.msra.mxu1 %v1183_v2  ;;  %v1181_v5 = vld [vmem:[#allocation8 + $0x28] sm:$0xff]  ;;  %v1172_v6 = vld [vmem:[#allocation5 + $0x20] sm:$0xff]  ;;  %v1171_v8 = vld [vmem:[#allocation5 + $0x18] sm:$0xff]  ;;  %v215_v27 = vshrl.u32 %v214_v25, 7 }
  0x39   :  { %v1180_v7 = vld [vmem:[#allocation8 + $0x20] sm:$0xff]  ;;  %v1179_v9 = vld [vmem:[#allocation8 + $0x18] sm:$0xff]  ;;  %v1170_v10 = vld [vmem:[#allocation5 + $0x10] sm:$0xff] }
  0x3a   :  { %v1178_v11 = vld [vmem:[#allocation8 + $0x10] sm:$0xff]  ;;  %v1169_v12 = vld [vmem:[#allocation5 + $0x8] sm:$0xff]  ;;  %v1168_v13 = vld [vmem:[#allocation5] sm:$0xff]  ;;  %vm216_vm1 = vcmp.lt.s32.totalorder %v215_v27, 4 }
  0x3b   :  { %289 = vmatpush.bf16.msra.mxu0 %v1174_v1  ;;  %v219_v14 = vld [vmem:[#allocation2] sm:$0xff]  ;;  %v1177_v16 = vld [vmem:[#allocation8 + $0x8] sm:$0xff]  ;;  %v1176_v17 = vld [vmem:[#allocation8] sm:$0xff]  ;;  %v1684_v32 = vsel %vm216_vm1, 1.0, %v1550_v31 }
  0x3c   :  { %373 = vmatpush.bf16.msra.mxu1 %v1182_v4  ;;  %v220_v15 = vpack.c.bf16 %v219_v14, %v219_v14  ;;  %v1240_v18 = vld [vmem:[#allocation7] ss:$0 sm:$0xff]  ;;  %v1190_v28 = vld [vmem:[#allocation14 + $0x30] sm:$0xff]  ;;  %v1241_v29 = vld [vmem:[#allocation10] ss:$0 sm:$0xff] }
  0x3d   :  { %v1191_v26 = vld [vmem:[#allocation14 + $0x38] sm:$0xff]  ;;  %v1189_v30 = vld [vmem:[#allocation14 + $0x28] sm:$0xff]  ;;  %v1188_v35 = vld [vmem:[#allocation14 + $0x20] sm:$0xff] }
  0x3e   :  { %495 = vmatpush.bf16.msra.mxu2 %v1191_v26  ;;  %v1187_v39 = vld [vmem:[#allocation14 + $0x18] sm:$0xff]  ;;  %v1186_v45 = vld [vmem:[#allocation14 + $0x10] sm:$0xff]  ;;  %v1185_v48 = vld [vmem:[#allocation14 + $0x8] sm:$0xff] }
  0x3f   :  { %290 = vmatpush.bf16.msra.mxu0 %v1173_v3  ;;  %v1184_v53 = vld [vmem:[#allocation14] sm:$0xff]  ;;  %v1242_v3 = vld [vmem:[#allocation11] ss:$0 sm:$0xff]  ;;  %v1206_v14 = vld [vmem:[#allocation16 + $0x74] sm:$0xf] }
  0x40   :  { %374 = vmatpush.bf16.msra.mxu1 %v1181_v5  ;;  %v1203_v25 = vld [vmem:[#allocation16 + $0x54] sm:$0xf0]  ;;  %v1202_v26 = vld [vmem:[#allocation16 + $0x54] sm:$0xf]  ;;  %v1244_v27 = vld [vmem:[%s1737_s8] ss:$0 sm:$0xff] }
  0x42   :  { %496 = vmatpush.bf16.msra.mxu2 %v1190_v28 }
  0x43   :  { %291 = vmatpush.bf16.msra.mxu0 %v1172_v6  ;;  %v1243_v6 = vld [vmem:[#allocation13] ss:$0 sm:$0xff] }
  0x44   :  { %375 = vmatpush.bf16.msra.mxu1 %v1180_v7 }
  0x46   :  { %497 = vmatpush.bf16.msra.mxu2 %v1189_v30 }
  0x47   :  { %292 = vmatpush.bf16.msra.mxu0 %v1171_v8 }
  0x48   :  { %376 = vmatpush.bf16.msra.mxu1 %v1179_v9 }
  0x4a   :  { %498 = vmatpush.bf16.msra.mxu2 %v1188_v35  ;;  %v1200_v35 = vld [vmem:[#allocation16 + $0x44] sm:$0xf] }
  0x4b   :  { %293 = vmatpush.bf16.msra.mxu0 %v1170_v10 }
  0x4c   :  { %377 = vmatpush.bf16.msra.mxu1 %v1178_v11 }
  0x4e   :  { %499 = vmatpush.bf16.msra.mxu2 %v1187_v39 }
  0x4f   :  { %294 = vmatpush.bf16.msra.mxu0 %v1169_v12  ;;  %v1098_v12 = vld [vmem:[#allocation16 + $0x70] sm:$0xf] }
  0x50   :  { %378 = vmatpush.bf16.msra.mxu1 %v1177_v16  ;;  %v1100_v16 = vld [vmem:[#allocation16 + $0x78] sm:$0xf0] }
  0x52   :  { %500 = vmatpush.bf16.msra.mxu2 %v1186_v45 }
  0x53   :  { %295 = vmatpush.bf16.msra.mxu0 %v1168_v13  ;;  %v1207_v13 = vld [vmem:[#allocation16 + $0x74] sm:$0xf0] }
  0x54   :  { %379 = vmatpush.bf16.msra.mxu1 %v1176_v17  ;;  %v1103_v17 = vor.u32 %v1206_v14, %v1100_v16 }
  0x56   :  { %296 = vmatmul.bf16.vlgmr.msra.gmra.mxu0 %v220_v15  ;;  %501 = vmatpush.bf16.msra.mxu2 %v1185_v48  ;;  %v1099_v15 = vor.u32 %v1207_v13, %v1098_v12 }
  0x57   :  { %665 = vmatpush.bf16.msrb.mxu0 %v1103_v17 }
  0x58   :  { %652 = vmatpush.bf16.msra.mxu3 %v1099_v15 }
  0x5a   :  { %502 = vmatpush.bf16.msra.mxu2 %v1184_v53  ;;  %v1197_v53 = vld [vmem:[#allocation16 + $0x24] sm:$0xf0] }
  0xd3   :  { %v297_v19 = vpop.f32.mrf.mxu0 }
  0xd4   :  { %v298_v20 = vadd.f32 %v1240_v18, %v297_v19  ;;  %v1090_v18 = vld [vmem:[#allocation16 + $0x60] sm:$0xf]  ;;  %v1205_v19 = vld [vmem:[#allocation16 + $0x64] sm:$0xf0] }
  0xd6   :  { %v302_v21 = vmul.f32 0.2, %v298_v20  ;;  %vm301_vm0 = vcmp.gt.f32.partialorder %v298_v20, 0.0 }
  0xd8   :  { %v303_v22 = vsel %vm301_vm0, %v298_v20, %v302_v21  ;;  %v1204_v20 = vld [vmem:[#allocation16 + $0x64] sm:$0xf]  ;;  %v1091_v21 = vor.u32 %v1205_v19, %v1090_v18 }
  0xd9   :  { %v304_v23 = vpack.c.bf16 %v303_v22, %v303_v22  ;;  %v1092_v22 = vld [vmem:[#allocation16 + $0x68] sm:$0xf0] }
  0xda   :  { %653 = vmatpush.bf16.msra.mxu3 %v1091_v21 }
  0xdb   :  { %v299_v24 = vpop.f32.mrf.mxu0  ;;  %380 = vmatmul.bf16.vlgmr.msra.gmra.mxu1 %v304_v23  ;;  %v1095_v23 = vor.u32 %v1204_v20, %v1092_v22 }
  0xdc   :  { %v1082_v24 = vld [vmem:[#allocation16 + $0x50] sm:$0xf] }
  0xdd   :  { %666 = vmatpush.bf16.msrb.mxu0 %v1095_v23  ;;  %v1083_v28 = vor.u32 %v1203_v25, %v1082_v24 }
  0xdf   :  { %654 = vmatpush.bf16.msra.mxu3 %v1083_v28 }
 0x158   :  { %v381_v33 = vpop.f32.mrf.mxu1 }
 0x159   :  { %v382_v34 = vadd.f32 %v1241_v29, %v381_v33  ;;  %v1084_v29 = vld [vmem:[#allocation16 + $0x58] sm:$0xf0]  ;;  %v1074_v33 = vld [vmem:[#allocation16 + $0x40] sm:$0xf] }
 0x15a   :  { %v1087_v30 = vor.u32 %v1202_v26, %v1084_v29 }
 0x15b   :  { %v385_v36 = vmul.f32 %v1684_v32, %v382_v34 }
 0x15c   :  { %667 = vmatpush.bf16.msrb.mxu0 %v1087_v30  ;;  %v1246_v30 = vld [vmem:[%s1739_s10] ss:$0 sm:$0xff] }
 0x15d   :  { %v386_v37 = vrot.slane %v385_v36, 4  ;;  %v392_v38 = vmul.f32 %v385_v36, %v382_v34 }
 0x15f   :  { %v387_v40 = vadd.f32 %v386_v37, %v385_v36  ;;  %v393_v41 = vrot.slane %v392_v38, 4 }
 0x160   :  { %v383_v42 = vpop.f32.mrf.mxu1 }
 0x161   :  { %v388_v43 = vrot.slane %v387_v40, 2  ;;  %v394_v44 = vadd.f32 %v393_v41, %v392_v38  ;;  %v1076_v38 = vld [vmem:[#allocation16 + $0x48] sm:$0xf0]  ;;  %v1066_v41 = vld [vmem:[#allocation16 + $0x30] sm:$0xf] }
 0x162   :  { %v1079_v39 = vor.u32 %v1200_v35, %v1076_v38  ;;  %v1199_v42 = vld [vmem:[#allocation16 + $0x34] sm:$0xf0]  ;;  %v210_v38 = vld [vmem:[%s1741_s12] sm:$0x3] }
 0x163   :  { %v389_v46 = vadd.f32 %v388_v43, %v387_v40  ;;  %v395_v47 = vrot.slane %v394_v44, 2  ;;  %v1198_v43 = vld [vmem:[#allocation16 + $0x34] sm:$0xf] }
 0x164   :  { %668 = vmatpush.bf16.msrb.mxu0 %v1079_v39  ;;  %v1222_v39 = vld [vmem:[#allocation17 + $0x70] sm:$0xff] }
 0x165   :  { %v390_v49 = vrot.slane %v389_v46, 1  ;;  %v396_v50 = vadd.f32 %v395_v47, %v394_v44  ;;  %v1068_v47 = vld [vmem:[#allocation16 + $0x38] sm:$0xf0] }
 0x166   :  { %v1071_v48 = vor.u32 %v1198_v43, %v1068_v47 }
 0x167   :  { %v391_v51 = vadd.f32 %v390_v49, %v389_v46  ;;  %v397_v52 = vrot.slane %v396_v50, 1  ;;  %v1067_v46 = vor.u32 %v1199_v42, %v1066_v41  ;;  %v569_v41 = vperm.slane %v210_v38, 1  ;;  %v1221_v42 = vld [vmem:[#allocation17 + $0x68] sm:$0xff] }
 0x168   :  { %669 = vmatpush.bf16.msrb.mxu0 %v1071_v48  ;;  %v568_v48 = vperm.slane %v210_v38, 0 }
 0x169   :  { %v398_v54 = vadd.f32 %v397_v52, %v396_v50  ;;  %v399_v55 = vmul.f32 0.25, %v391_v51  ;;  %v1058_v52 = vld [vmem:[#allocation16 + $0x20] sm:$0xf] }
 0x16b   :  { %v400_v56 = vmul.f32 0.25, %v398_v54  ;;  %v401_v57 = vmul.f32 %v399_v55, %v399_v55  ;;  %v403_v2 = vsub.f32 %v382_v34, %v399_v55  ;;  %v1201_v34 = vld [vmem:[#allocation16 + $0x44] sm:$0xf0]  ;;  %v1196_v54 = vld [vmem:[#allocation16 + $0x24] sm:$0xf] }
 0x16c   :  { %v1075_v37 = vor.u32 %v1201_v34, %v1074_v33 }
 0x16d   :  { %v402_v58 = vsub.f32 %v400_v56, %v401_v57  ;;  %v1059_v57 = vor.u32 %v1197_v53, %v1058_v52  ;;  %v1219_v53 = vld [vmem:[#allocation17 + $0x58] sm:$0xff] }
 0x16e   :  { %655 = vmatpush.bf16.msra.mxu3 %v1075_v37 }
 0x16f   :  { %v404_v59 = vadd.f32 0.8, %v402_v58  ;;  %v1060_v58 = vld [vmem:[#allocation16 + $0x28] sm:$0xf0] }
 0x171   :  { %1248 = vrsqrt.f32 %v404_v59  ;;  %vm411_vm3 = vweird.f32 %v404_v59 }
 0x172   :  { %656 = vmatpush.bf16.msra.mxu3 %v1067_v46  ;;  %v1220_v46 = vld [vmem:[#allocation17 + $0x60] sm:$0xff] }
 0x176   :  { %657 = vmatpush.bf16.msra.mxu3 %v1059_v57 }
 0x177   :  { %v1249_v60 = vpop.eup %1248 }
 0x178   :  { %v406_v61 = vmul.f32 %v1249_v60, %v404_v59  ;;  %vm412_vm2 = vweird.f32 %v1249_v60  ;;  %v1063_v59 = vor.u32 %v1196_v54, %v1060_v58  ;;  %v1212_v58 = vld [vmem:[#allocation17 + $0x20] sm:$0xff] }
 0x179   :  { %vm413_vm4 = vmor %vm411_vm3, %vm412_vm2 }
 0x17a   :  { %v407_v62 = vmul.f32 %v1249_v60, %v406_v61  ;;  %670 = vmatpush.bf16.msrb.mxu0 %v1063_v59 }
 0x17c   :  { %v408_v63 = vmul.f32 0.5, %v407_v62  ;;  %v1050_v62 = vld [vmem:[#allocation16 + $0x10] sm:$0xf] }
 0x17e   :  { %v409_v0 = vsub.f32 1.5, %v408_v63  ;;  %v1195_v63 = vld [vmem:[#allocation16 + $0x14] sm:$0xf0] }
 0x180   :  { %v410_v1 = vmul.f32 %v1249_v60, %v409_v0  ;;  %v1051_v0 = vor.u32 %v1195_v63, %v1050_v62  ;;  %v1218_v62 = vld [vmem:[#allocation17 + $0x50] sm:$0xff] }
 0x182   :  { %v414_v4 = vsel %vm413_vm4, %v1249_v60, %v410_v1  ;;  %v1194_v1 = vld [vmem:[#allocation16 + $0x14] sm:$0xf]  ;;  %658 = vmatpush.bf16.msra.mxu3 %v1051_v0 }
 0x183   :  { %v415_v5 = vmul.f32 %v414_v4, %v403_v2  ;;  %v1052_v2 = vld [vmem:[#allocation16 + $0x18] sm:$0xf0] }
 0x185   :  { %v419_v7 = vmul.f32 %v1242_v3, %v415_v5  ;;  %v1042_v3 = vld [vmem:[#allocation16] sm:$0xf] }
 0x187   :  { %v423_v8 = vadd.f32 %v1243_v6, %v419_v7  ;;  %v1055_v6 = vor.u32 %v1194_v1, %v1052_v2  ;;  %v1193_v7 = vld [vmem:[#allocation16 + $0x4] sm:$0xf0] }
 0x188   :  { %v1043_v12 = vor.u32 %v1193_v7, %v1042_v3  ;;  %v1211_v3 = vld [vmem:[#allocation17 + $0x18] sm:$0xff] }
 0x189   :  { %vm424_vm5 = vcmp.gt.f32.partialorder %v423_v8, 0.0  ;;  %v425_v9 = vmul.f32 0.2, %v423_v8  ;;  %671 = vmatpush.bf16.msrb.mxu0 %v1055_v6 }
 0x18a   :  { %659 = vmatpush.bf16.msra.mxu3 %v1043_v12 }
 0x18b   :  { %v426_v10 = vsel %vm424_vm5, %v423_v8, %v425_v9  ;;  %v1192_v8 = vld [vmem:[#allocation16 + $0x4] sm:$0xf]  ;;  %v1044_v9 = vld [vmem:[#allocation16 + $0x8] sm:$0xf0] }
 0x18c   :  { %v427_v11 = vpack.c.bf16 %v426_v10, %v426_v10  ;;  %v1047_v13 = vor.u32 %v1192_v8, %v1044_v9  ;;  %v1217_v9 = vld [vmem:[#allocation17 + $0x48] sm:$0xff] }
 0x18e   :  { %503 = vmatmul.bf16.vlgmr.msra.gmra.mxu2 %v427_v11  ;;  %672 = vmatpush.bf16.msrb.mxu0 %v1047_v13  ;;  %v1210_v13 = vld [vmem:[#allocation17 + $0x10] sm:$0xff] }
 0x211   :  { %v504_v31 = vpop.f32.mrf.mxu2 }
 0x212   :  { %v1690_v36 = vadd.f32 %v1244_v27, %v504_v31  ;;  %v1245_v27 = vld [vmem:[%s1738_s9] ss:$0 sm:$0xff] }
 0x214   :  { %v508_v40 = vmul.f32 %v1684_v32, %v1690_v36 }
 0x216   :  { %v509_v44 = vrot.slane %v508_v40, 4  ;;  %v515_v45 = vmul.f32 %v508_v40, %v1690_v36 }
 0x218   :  { %v510_v49 = vadd.f32 %v509_v44, %v508_v40  ;;  %v516_v50 = vrot.slane %v515_v45, 4  ;;  %v1215_v40 = vld [vmem:[#allocation17 + $0x38] sm:$0xff]  ;;  %v1214_v44 = vld [vmem:[#allocation17 + $0x30] sm:$0xff] }
 0x219   :  { %v506_v51 = vpop.f32.mrf.mxu2  ;;  %893 = vmatpush.bf16.msrb.mxu1 %v1215_v40 }
 0x21a   :  { %v511_v55 = vrot.slane %v510_v49, 2  ;;  %v517_v56 = vadd.f32 %v516_v50, %v515_v45 }
 0x21c   :  { %v512_v60 = vadd.f32 %v511_v55, %v510_v49  ;;  %v518_v61 = vrot.slane %v517_v56, 2  ;;  %v1213_v49 = vld [vmem:[#allocation17 + $0x28] sm:$0xff] }
 0x21d   :  { %894 = vmatpush.bf16.msrb.mxu1 %v1214_v44 }
 0x21e   :  { %v513_v4 = vrot.slane %v512_v60, 1  ;;  %v519_v5 = vadd.f32 %v518_v61, %v517_v56 }
 0x220   :  { %v514_v10 = vadd.f32 %v513_v4, %v512_v60  ;;  %v520_v11 = vrot.slane %v519_v5, 1 }
 0x221   :  { %895 = vmatpush.bf16.msrb.mxu1 %v1213_v49 }
 0x222   :  { %v521_v14 = vadd.f32 %v520_v11, %v519_v5  ;;  %v522_v15 = vmul.f32 0.25, %v514_v10 }
 0x224   :  { %v523_v16 = vmul.f32 0.25, %v521_v14  ;;  %v524_v17 = vmul.f32 %v522_v15, %v522_v15  ;;  %v526_v26 = vsub.f32 %v1690_v36, %v522_v15  ;;  %v1223_v36 = vld [vmem:[#allocation17 + $0x78] sm:$0xff] }
 0x225   :  { %906 = vmatpush.bf16.msrb.mxu2 %v1223_v36  ;;  %896 = vmatpush.bf16.msrb.mxu1 %v1212_v58 }
 0x226   :  { %v525_v18 = vsub.f32 %v523_v16, %v524_v17 }
 0x228   :  { %v527_v19 = vadd.f32 0.8, %v525_v18  ;;  %v1216_v18 = vld [vmem:[#allocation17 + $0x40] sm:$0xff] }
 0x229   :  { %907 = vmatpush.bf16.msrb.mxu2 %v1222_v39  ;;  %897 = vmatpush.bf16.msrb.mxu1 %v1211_v3 }
 0x22a   :  { %1250 = vrsqrt.f32 %v527_v19  ;;  %vm534_vm7 = vweird.f32 %v527_v19 }
 0x22d   :  { %908 = vmatpush.bf16.msrb.mxu2 %v1221_v42  ;;  %898 = vmatpush.bf16.msrb.mxu1 %v1210_v13 }
 0x230   :  { %v1251_v20 = vpop.eup %1250 }
 0x231   :  { %v529_v21 = vmul.f32 %v1251_v20, %v527_v19  ;;  %vm535_vm6 = vweird.f32 %v1251_v20  ;;  %909 = vmatpush.bf16.msrb.mxu2 %v1220_v46  ;;  %v212_v46 = vld [vmem:[%s1743_s14] sm:$0x3] }
 0x232   :  { %vm536_vm8 = vmor %vm534_vm7, %vm535_vm6 }
 0x233   :  { %v530_v22 = vmul.f32 %v1251_v20, %v529_v21 }
 0x235   :  { %v531_v23 = vmul.f32 0.5, %v530_v22  ;;  %910 = vmatpush.bf16.msrb.mxu2 %v1219_v53  ;;  %v749_v53 = vperm.slane %v212_v46, 1 }
 0x237   :  { %v532_v24 = vsub.f32 1.5, %v531_v23  ;;  %v1209_v23 = vld [vmem:[#allocation17 + $0x8] sm:$0xff] }
 0x238   :  { %899 = vmatpush.bf16.msrb.mxu1 %v1209_v23 }
 0x239   :  { %v533_v25 = vmul.f32 %v1251_v20, %v532_v24  ;;  %911 = vmatpush.bf16.msrb.mxu2 %v1218_v62 }
 0x23b   :  { %v537_v28 = vsel %vm536_vm8, %v1251_v20, %v533_v25 }
 0x23c   :  { %v538_v29 = vmul.f32 %v537_v28, %v526_v26 }
 0x23d   :  { %912 = vmatpush.bf16.msrb.mxu2 %v1217_v9 }
 0x23e   :  { %v542_v31 = vmul.f32 %v1245_v27, %v538_v29  ;;  %v1208_v27 = vld [vmem:[#allocation17] sm:$0xff] }
 0x23f   :  { %900 = vmatpush.bf16.msrb.mxu1 %v1208_v27 }
 0x240   :  { %v546_v33 = vadd.f32 %v1246_v30, %v542_v31 }
 0x241   :  { %913 = vmatpush.bf16.msrb.mxu2 %v1216_v18 }
 0x242   :  { %vm547_vm9 = vcmp.gt.f32.partialorder %v546_v33, 0.0  ;;  %v548_v34 = vmul.f32 0.2, %v546_v33 }
 0x244   :  { %v549_v35 = vsel %vm547_vm9, %v546_v33, %v548_v34 }
 0x245   :  { %v550_v37 = vpack.c.bf16 %v549_v35, %v549_v35 }
 0x247   :  { %660 = vmatmul.bf16.vlgmr.msra.gmra.mxu3 %v550_v37  ;;  %673 = vmatmul.bf16.vlgmr.msrb.gmra.mxu0 %v550_v37 }
 0x2c4   :  { %v674_v43 = vpop.f32.mrf.mxu0 }
 0x2c5   :  { %v1705_v45 = vadd.f32 %v674_v43, %v569_v41  ;;  %v211_v41 = vld [vmem:[%s1742_s13] sm:$0x3] }
 0x2c7   :  { %v679_v47 = vmul.f32 %v1684_v32, %v1705_v45 }
 0x2c9   :  { %v686_v50 = vrot.slane %v679_v47, 4  ;;  %v693_v51 = vmul.f32 %v679_v47, %v1705_v45 }
 0x2ca   :  { %v661_v52 = vpop.f32.mrf.mxu3 }
 0x2cb   :  { %v687_v54 = vadd.f32 %v686_v50, %v679_v47  ;;  %v700_v55 = vrot.slane %v693_v51, 4  ;;  %v1710_v56 = vadd.f32 %v661_v52, %v568_v48  ;;  %v742_v48 = vperm.slane %v211_v41, 1 }
 0x2cc   :  { %v676_v57 = vpop.f32.mrf.mxu0 }
 0x2cd   :  { %v688_v59 = vrot.slane %v687_v54, 2  ;;  %v701_v60 = vadd.f32 %v700_v55, %v693_v51  ;;  %v678_v61 = vmul.f32 %v1684_v32, %v1710_v56 }
 0x2cf   :  { %v689_v63 = vadd.f32 %v688_v59, %v687_v54  ;;  %v702_v0 = vrot.slane %v701_v60, 2  ;;  %v680_v1 = vrot.slane %v678_v61, 4  ;;  %v692_v2 = vmul.f32 %v678_v61, %v1710_v56 }
 0x2d1   :  { %v690_v4 = vrot.slane %v689_v63, 1  ;;  %v703_v5 = vadd.f32 %v702_v0, %v701_v60  ;;  %v681_v6 = vadd.f32 %v680_v1, %v678_v61  ;;  %v694_v7 = vrot.slane %v692_v2, 4 }
 0x2d2   :  { %v663_v8 = vpop.f32.mrf.mxu3  ;;  %v741_v60 = vperm.slane %v211_v41, 0 }
 0x2d3   :  { %v691_v10 = vadd.f32 %v690_v4, %v689_v63  ;;  %v704_v11 = vrot.slane %v703_v5, 1  ;;  %v682_v12 = vrot.slane %v681_v6, 2  ;;  %v695_v32 = vadd.f32 %v694_v7, %v692_v2 }
 0x2d4   :  { %v748_v63 = vperm.slane %v212_v46, 0 }
 0x2d5   :  { %v705_v14 = vadd.f32 %v704_v11, %v703_v5  ;;  %v707_v15 = vmul.f32 0.25, %v691_v10  ;;  %v683_v16 = vadd.f32 %v682_v12, %v681_v6  ;;  %v696_v17 = vrot.slane %v695_v32, 2 }
 0x2d7   :  { %v709_v19 = vmul.f32 0.25, %v705_v14  ;;  %v711_v20 = vmul.f32 %v707_v15, %v707_v15  ;;  %v684_v21 = vrot.slane %v683_v16, 1  ;;  %v697_v22 = vadd.f32 %v696_v17, %v695_v32 }
 0x2d8   :  { %v715_v47 = vsub.f32 %v1705_v45, %v707_v15 }
 0x2d9   :  { %v713_v24 = vsub.f32 %v709_v19, %v711_v20  ;;  %v685_v25 = vadd.f32 %v684_v21, %v683_v16  ;;  %v698_v26 = vrot.slane %v697_v22, 1 }
 0x2db   :  { %v717_v28 = vadd.f32 0.8, %v713_v24  ;;  %v706_v29 = vmul.f32 0.25, %v685_v25  ;;  %v699_v30 = vadd.f32 %v698_v26, %v697_v22 }
 0x2dd   :  { %1252 = vrsqrt.f32 %v717_v28  ;;  %v710_v31 = vmul.f32 %v706_v29, %v706_v29  ;;  %v708_v33 = vmul.f32 0.25, %v699_v30  ;;  %vm734_vm11 = vweird.f32 %v717_v28 }
 0x2de   :  { %v714_v59 = vsub.f32 %v1710_v56, %v706_v29  ;;  %v1247_v56 = vld [vmem:[%s1745_s16] ss:$0 sm:$0xff] }
 0x2df   :  { %v712_v34 = vsub.f32 %v708_v33, %v710_v31 }
 0x2e1   :  { %v716_v35 = vadd.f32 0.8, %v712_v34 }
 0x2e3   :  { %v1253_v37 = vpop.eup %1252  ;;  %1254 = vrsqrt.f32 %v716_v35  ;;  %vm724_vm14 = vweird.f32 %v716_v35 }
 0x2e4   :  { %v729_v36 = vmul.f32 %v1253_v37, %v717_v28  ;;  %vm735_vm10 = vweird.f32 %v1253_v37 }
 0x2e5   :  { %vm736_vm12 = vmor %vm734_vm11, %vm735_vm10 }
 0x2e6   :  { %v730_v38 = vmul.f32 %v1253_v37, %v729_v36 }
 0x2e8   :  { %v731_v39 = vmul.f32 0.5, %v730_v38 }
 0x2e9   :  { %v1255_v40 = vpop.eup %1254 }
 0x2ea   :  { %v732_v42 = vsub.f32 1.5, %v731_v39  ;;  %v719_v43 = vmul.f32 %v1255_v40, %v716_v35  ;;  %vm725_vm13 = vweird.f32 %v1255_v40 }
 0x2eb   :  { %vm726_vm15 = vmor %vm724_vm14, %vm725_vm13 }
 0x2ec   :  { %v733_v44 = vmul.f32 %v1253_v37, %v732_v42  ;;  %v720_v49 = vmul.f32 %v1255_v40, %v719_v43 }
 0x2ee   :  { %v737_v50 = vsel %vm736_vm12, %v1253_v37, %v733_v44  ;;  %v721_v52 = vmul.f32 0.5, %v720_v49 }
 0x2ef   :  { %v739_v51 = vmul.f32 %v737_v50, %v715_v47 }
 0x2f0   :  { %v722_v55 = vsub.f32 1.5, %v721_v52 }
 0x2f1   :  { %v746_v54 = vmul.f32 %v742_v48, %v739_v51 }
 0x2f2   :  { %v723_v57 = vmul.f32 %v1255_v40, %v722_v55 }
 0x2f3   :  { %v753_v58 = vadd.f32 %v749_v53, %v746_v54 }
 0x2f4   :  { %v727_v61 = vsel %vm726_vm15, %v1255_v40, %v723_v57 }
 0x2f5   :  { %vm755_vm0 = vcmp.gt.f32.partialorder %v753_v58, 0.0  ;;  %v757_v45 = vmul.f32 0.2, %v753_v58  ;;  %v738_v62 = vmul.f32 %v727_v61, %v714_v59 }
 0x2f7   :  { %v759_v0 = vsel %vm755_vm0, %v753_v58, %v757_v45  ;;  %v745_v1 = vmul.f32 %v741_v60, %v738_v62 }
 0x2f8   :  { %v761_v2 = vpack.c.bf16 %v759_v0, %v759_v0 }
 0x2f9   :  { %v752_v3 = vadd.f32 %v748_v63, %v745_v1 }
 0x2fa   :  { %914 = vmatmul.bf16.vlgmr.msrb.gmra.mxu2 %v761_v2 }
 0x2fb   :  { %vm754_vm1 = vcmp.gt.f32.partialorder %v752_v3, 0.0  ;;  %v756_v4 = vmul.f32 0.2, %v752_v3 }
 0x2fd   :  { %v758_v5 = vsel %vm754_vm1, %v752_v3, %v756_v4 }
 0x2fe   :  { %v760_v6 = vpack.c.bf16 %v758_v5, %v758_v5 }
 0x300   :  { %901 = vmatmul.bf16.vlgmr.msrb.gmra.mxu1 %v760_v6 }
 0x37d   :  { %v915_v7 = vpop.f32.mrf.mxu2  ;;  %v902_v8 = vpop.f32.mrf.mxu1 }
 0x37e   :  { %v903_v9 = vadd.f32 %v1247_v56, %v902_v8 }
 0x380   :  { %v916_v10 = vadd.f32 %v915_v7, %v903_v9 }
 0x382   :  { %1256 = vtanh.f32 %v916_v10 }
 0x385   :  { %v917_v11 = vpop.f32.mrf.mxu2  ;;  %v904_v12 = vpop.f32.mrf.mxu1 }
 0x388   :  { %v1257_v32 = vpop.eup %1256 }
 0x389   :  { %920 = vst [vmem:[#allocation19] sm:$0xff] %v1257_v32 }
 0x38a   :  { %931 = dma.vmem_to_hbm [thread:$0]  %s927_s5, 128, %s929_s21, [#allocation4]  }
 0x38b   :  { %1534 = dma.done.wait [#allocation4], 128  }
 0x38c   :  { %1535 = vsyncadd [#allocation4], 4294967168 }
 0x38d   :  { %936 = vsyncpa [#allocation3], 1 }
 0x38e   :  { %937 = vsyncpa [#allocation6], 1 }
 0x38f   :  { %938 = vsyncpa [#allocation9], 1 }
 0x390   :  { %939 = vsyncpa [#allocation12], 1 }
 0x391   :  { %940 = vsyncpa [#allocation15], 1 }
 0x392   :  { %941 = vsyncpa [#allocation18], 1 }
 0x393   :  { %942 = vsyncpa [#allocation4], 1 }

</bundles_post_ra>
